<compile_context>
chip_gen: v7x
topology: tpu7x:2x2x1
jax: 0.10.0
libtpu: 0.0.40
codegen_flags: <defaults>
</compile_context>

<pallas_src>
import jax
import jax.numpy as jnp
from jax.experimental import pallas as pl
from jax.experimental.pallas import tpu as pltpu

_LANE = 128
_SUBLANE_ALIGN = 32                      # multiple of 8 (f32) / 16 (bf16) / 32 (8-bit) packing
_TARGET_BLOCK_BYTES = 2 * 1024 * 1024    # ~2 MiB per block per operand


def _swish_kernel(x_ref, o_ref):
    x = x_ref[...]
    if x.dtype in (jnp.dtype(jnp.float32), jnp.dtype(jnp.bfloat16)):
        # Native-precision path (bf16 VPU/EUP on v6e/v7x; compiler handles v5e).
        o_ref[...] = x * jax.nn.sigmoid(x)
    else:
        xf = x.astype(jnp.float32)
        o_ref[...] = (xf * jax.nn.sigmoid(xf)).astype(o_ref.dtype)


def _round_up(v: int, m: int) -> int:
    return ((v + m - 1) // m) * m


@jax.jit
def swish(x: jnp.ndarray) -> jnp.ndarray:
    """Swish / SiLU over an arbitrary-shaped array via a tiled Pallas kernel."""
    orig_shape = x.shape
    orig_dtype = x.dtype
    total = x.size

    itemsize = jnp.dtype(orig_dtype).itemsize
    # Rows per block targeting ~2 MiB blocks, never below one aligned sublane group.
    target_tm = max(_SUBLANE_ALIGN, _TARGET_BLOCK_BYTES // (_LANE * itemsize))

    rows = pl.cdiv(total, _LANE)
    num_blocks = max(1, pl.cdiv(rows, target_tm))
    tm = _round_up(pl.cdiv(rows, num_blocks), _SUBLANE_ALIGN)
    padded_rows = tm * num_blocks
    padded_total = padded_rows * _LANE

    flat = x.reshape(-1)
    if padded_total != total:
        # swish(0) == 0, so zero padding is harmless and trimmed below.
        flat = jnp.pad(flat, (0, padded_total - total))
    slab = flat.reshape(padded_rows, _LANE)

    out = pl.pallas_call(
        _swish_kernel,
        out_shape=jax.ShapeDtypeStruct((padded_rows, _LANE), orig_dtype),
        grid_spec=pltpu.PrefetchScalarGridSpec(
            num_scalar_prefetch=0,
            grid=(num_blocks,),
            in_specs=[pl.BlockSpec((tm, _LANE), lambda i: (i, 0))],
            out_specs=pl.BlockSpec((tm, _LANE), lambda i: (i, 0)),
        ),
        input_output_aliases={0: 0},
        compiler_params=pltpu.CompilerParams(
            dimension_semantics=("parallel",),
        ),
    )(slab)

    out_flat = out.reshape(-1)
    if padded_total != total:
        out_flat = out_flat[:total]
    return out_flat.reshape(orig_shape)


if __name__ == "__main__":
    key = jax.random.PRNGKey(0)
    # Small NCHW input consistent with a conv-net activation: batch=2, channels=4, 16x16 spatial.
    x = jax.random.normal(key, (2, 4, 16, 16), dtype=jnp.float32)

    y = swish(x)
    y = jax.block_until_ready(y)

    # Reference check against plain-JAX swish.
    y_ref = x * jax.nn.sigmoid(x)
    assert y.shape == x.shape and y.dtype == x.dtype
    assert jnp.allclose(y, y_ref, atol=1e-6, rtol=1e-6)

    # Also exercise a larger, non-multiple shape + bf16 path to cover padding / native-bf16 branch.
    xb = jax.random.normal(jax.random.PRNGKey(1), (3, 5, 17, 31), dtype=jnp.bfloat16)
    yb = jax.block_until_ready(swish(xb))
    yb_ref = xb * jax.nn.sigmoid(xb)
    assert yb.shape == xb.shape and yb.dtype == xb.dtype
    assert jnp.allclose(yb.astype(jnp.float32), yb_ref.astype(jnp.float32), atol=2e-2, rtol=2e-2)

    print("KERNEL_OK")
</pallas_src>

<mosaic_0001>
module attributes {stable_mosaic.version = 11 : i64} {
  func.func @_swish_kernel(%arg0: i32, %arg1: memref<32x128xf32, #tpu.memory_space<vmem>>, %arg2: memref<32x128xf32, #tpu.memory_space<vmem>>) attributes {dimension_semantics = [#tpu.dimension_semantics<parallel>], iteration_bounds = array<i64: 1>, scalar_prefetch = 0 : i64, scratch_operands = 0 : i64, tpu.core_type = #tpu.core_type<tc>, window_params = [{transform_indices = @transform_0, window_bounds = array<i64: 32, 128>}, {transform_indices = @transform_1, window_bounds = array<i64: 32, 128>}]} {
    %c0 = arith.constant 0 : index
    %c0_0 = arith.constant 0 : index
    %0 = vector.load %arg1[%c0, %c0_0] : memref<32x128xf32, #tpu.memory_space<vmem>>, vector<32x128xf32>
    %1 = arith.negf %0 : vector<32x128xf32>
    %2 = math.exp %1 : vector<32x128xf32>
    %cst = arith.constant 1.000000e+00 : f32
    %3 = vector.broadcast %cst : f32 to vector<32x128xf32>
    %4 = arith.addf %3, %2 : vector<32x128xf32>
    %5 = arith.divf %3, %4 : vector<32x128xf32>
    %6 = arith.mulf %0, %5 : vector<32x128xf32>
    %c0_1 = arith.constant 0 : index
    %c0_2 = arith.constant 0 : index
    %7 = vector.load %arg2[%c0_1, %c0_2] : memref<32x128xf32, #tpu.memory_space<vmem>>, vector<32x128xf32>
    tpu.vector_store %arg2[%c0_1, %c0_2], %6 {strides = array<i32>} : memref<32x128xf32, #tpu.memory_space<vmem>>, vector<32x128xf32>,
    return
  }
  func.func @transform_0(%arg0: i32) -> (i32, i32) {
    %c0_i32 = arith.constant 0 : i32
    %c0_i32_0 = arith.constant 0 : i32
    return %arg0, %c0_i32 : i32, i32
  }
  func.func @transform_1(%arg0: i32) -> (i32, i32) {
    %c0_i32 = arith.constant 0 : i32
    %c0_i32_0 = arith.constant 0 : i32
    return %arg0, %c0_i32 : i32, i32
  }
}

</mosaic_0001>

<bundles_post_ra>
// kernel: swish.1
= control target key start
LH: loop header
LB: loop body
LE: loop exit
PB: predicated region body
PF: predicated region fallthrough
CT: control target
= control target key end

     0   :  { %s102_s0 = inlined_call_operand.vmem [shape: f32[32,128], index: 0, kind: input, shape index: {}, may-alias: {0,1}]   ;;  %s103_s1 = inlined_call_operand.vmem [shape: f32[32,128], index: 1, kind: output, shape index: {}, may-alias: {0,1}]  }
   0x1   :  { %v8_v0 = vld [vmem:[%s102_s0] sm:$0xff]  ;;  %v9_v1 = vld [vmem:[%s102_s0 + $0x8] sm:$0xff]  ;;  %v10_v2 = vld [vmem:[%s102_s0 + $0x10] sm:$0xff] }
   0x2   :  { %v48_v3 = vmul.f32 -1.442695, %v8_v0  ;;  %v49_v4 = vmul.f32 -1.442695, %v9_v1  ;;  %v50_v5 = vmul.f32 -1.442695, %v10_v2 }
   0x3   :  { %v11_v6 = vld [vmem:[%s102_s0 + $0x18] sm:$0xff] }
   0x4   :  { %52 = vpow2.f32 %v48_v3  ;;  %v51_v7 = vmul.f32 -1.442695, %v11_v6 }
   0x5   :  { %54 = vpow2.f32 %v49_v4 }
   0x6   :  { %56 = vpow2.f32 %v50_v5 }
   0x7   :  { %58 = vpow2.f32 %v51_v7 }
   0xe   :  { %v53_v8 = vpop.eup %52 }
   0xf   :  { %v55_v9 = vpop.eup %54  ;;  %v24_v10 = vadd.f32 1.0, %v53_v8 }
  0x10   :  { %v57_v11 = vpop.eup %56  ;;  %v25_v12 = vadd.f32 1.0, %v55_v9 }
  0x11   :  { %v59_v13 = vpop.eup %58  ;;  %60 = vrcp.f32 %v24_v10  ;;  %v26_v14 = vadd.f32 1.0, %v57_v11 }
  0x12   :  { %62 = vrcp.f32 %v25_v12  ;;  %v27_v15 = vadd.f32 1.0, %v59_v13 }
  0x13   :  { %64 = vrcp.f32 %v26_v14 }
  0x14   :  { %66 = vrcp.f32 %v27_v15 }
  0x1b   :  { %v61_v16 = vpop.eup %60 }
  0x1c   :  { %v63_v17 = vpop.eup %62  ;;  %v36_v18 = vmul.f32 %v61_v16, %v8_v0 }
  0x1d   :  { %v65_v19 = vpop.eup %64  ;;  %v37_v20 = vmul.f32 %v63_v17, %v9_v1 }
  0x1e   :  { %v67_v21 = vpop.eup %66  ;;  %40 = vst [vmem:[%s103_s1] sm:$0xff] %v36_v18  ;;  %v38_v22 = vmul.f32 %v65_v19, %v10_v2 }
  0x1f   :  { %41 = vst [vmem:[%s103_s1 + $0x8] sm:$0xff] %v37_v20  ;;  %v39_v23 = vmul.f32 %v67_v21, %v11_v6 }
  0x20   :  { %42 = vst [vmem:[%s103_s1 + $0x10] sm:$0xff] %v38_v22 }
  0x21   :  { %43 = vst [vmem:[%s103_s1 + $0x18] sm:$0xff] %v39_v23 }

</bundles_post_ra>
